<compile_context>
chip_gen: v6e
topology: v6e:2x2x1
jax: 0.10.0
libtpu: 0.0.40
codegen_flags: <defaults>
</compile_context>

<pallas_src>
import functools

import jax
import jax.numpy as jnp
from jax.experimental import pallas as pl
from jax.experimental.pallas import tpu as pltpu


def aft_full_kernel(q_ref, kv_ref, wq_ref, bq_ref, wkv_ref, bkv_ref,
                    u_ref, vb_ref, out_ref, e2_ref, *,
                    hidden_dim, compute_dtype):
    """One (batch b, query-tile i) grid step.

    e2_ref is a persistent VMEM scratch holding [ek*v | ek] for the current
    batch element; it is recomputed only on the first query tile of each batch
    (program_id(1) == 0) and reused by every subsequent query tile.
    """
    H = hidden_dim
    cd = compute_dtype

    # ---- per-batch work: fused K/V projection + stable exps, cached --------
    @pl.when(pl.program_id(1) == 0)
    def _():
        kvp = jnp.dot(kv_ref[...].astype(cd), wkv_ref[...].astype(cd),
                      preferred_element_type=jnp.float32) + bkv_ref[...]
        k = kvp[:, :H]                                   # (Tkv, H)
        v = kvp[:, H:]                                   # (Tkv, H)
        m_k = jnp.max(k, axis=0, keepdims=True)          # (1, H) per-feature shift
        ek = jnp.exp(k - m_k)                            # (Tkv, H)
        # Lane-aligned concat (H multiple of 128): [ekv | ek] -> (Tkv, 2H).
        e2_ref[...] = jnp.concatenate([ek * v, ek], axis=-1).astype(cd)

    # ---- per-query-tile work ------------------------------------------------
    # Positional-bias tile generated in-kernel: (tq, bias_dim)@(bias_dim, Tkv).
    wb = jnp.dot(u_ref[...].astype(cd), vb_ref[...].astype(cd),
                 preferred_element_type=jnp.float32)     # (tq, Tkv)
    m_w = jnp.max(wb, axis=1, keepdims=True)             # (tq, 1) per-row shift
    ew = jnp.exp(wb - m_w).astype(cd)                    # (tq, Tkv)

    # One fused MXU matmul for num|den: (tq, Tkv) @ (Tkv, 2H).
    # (The exp(m_k + m_w) factors cancel exactly in num/den.)
    nd = jnp.dot(ew, e2_ref[...], preferred_element_type=jnp.float32)
    num = nd[:, :H]                                      # (tq, H)
    den = nd[:, H:]                                      # (tq, H)

    # EUP approximate reciprocal + one Newton refinement (~f32 accurate).
    r = pl.reciprocal(den, approx=True)
    r = r * (2.0 - den * r)

    # Q projection and sigmoid gate.
    qp = jnp.dot(q_ref[...].astype(cd), wq_ref[...].astype(cd),
                 preferred_element_type=jnp.float32) + bq_ref[...]

    out_ref[...] = (jax.nn.sigmoid(qp) * (num * r)).astype(out_ref.dtype)


def _vmem_limit_bytes():
    # Generation-aware scoped-VMEM request with headroom for compiler scratch:
    # ~48 MiB on v7x (64 MiB physical), ~96 MiB on v5e/v6e (128 MiB physical).
    try:
        cap = int(pltpu.get_tpu_info().vmem_capacity_bytes)
        return (cap * 3) // 4
    except Exception:
        return 64 * 1024 * 1024


def aft_full(q, kv, params, *, compute_dtype=jnp.bfloat16, tq_tile=None):
    B, Tq, dim = q.shape
    _, Tkv, _ = kv.shape
    H = params["wq"].shape[1]
    bias_dim = params["u"].shape[1]

    # Fused K/V weights / biases: (dim, 2H), (1, 2H).  The in-kernel split of
    # the fused projection is lane-aligned (free) when H % 128 == 0.
    wkv = jnp.concatenate([params["wk"], params["wv"]], axis=1)
    bkv = jnp.concatenate([params["bk"], params["bv"]], axis=1)

    # Query-tile size: target 256 (MXU M width); partial final blocks are
    # handled by Pallas (per-row independence keeps valid rows correct).
    if tq_tile is None:
        tq_tile = min(Tq, 256)
    tq_tile = min(tq_tile, Tq)
    if tq_tile < Tq and tq_tile % 8 != 0:
        tq_tile = max(8, (tq_tile // 8) * 8)
    n_tq = pl.cdiv(Tq, tq_tile)

    kernel = functools.partial(aft_full_kernel, hidden_dim=H,
                               compute_dtype=compute_dtype)

    def const2d(shape):
        # Grid-invariant block: block index never changes, so it is DMA'd once.
        return pl.BlockSpec(shape, lambda b, i: (0, 0))

    return pl.pallas_call(
        kernel,
        out_shape=jax.ShapeDtypeStruct((B, Tq, H), jnp.float32),
        grid_spec=pltpu.PrefetchScalarGridSpec(
            num_scalar_prefetch=0,
            grid=(B, n_tq),
            in_specs=[
                pl.BlockSpec((pl.Squeezed(), tq_tile, dim),
                             lambda b, i: (b, i, 0)),                    # q tile
                pl.BlockSpec((pl.Squeezed(), Tkv, dim),
                             lambda b, i: (b, 0, 0)),                    # kv (per b)
                const2d((dim, H)),                                       # Wq
                const2d((1, H)),                                         # bq
                const2d((dim, 2 * H)),                                   # Wkv fused
                const2d((1, 2 * H)),                                     # bkv fused
                pl.BlockSpec((tq_tile, bias_dim), lambda b, i: (i, 0)),  # u tile
                const2d((bias_dim, Tkv)),                                # v bias
            ],
            out_specs=pl.BlockSpec((pl.Squeezed(), tq_tile, H),
                                   lambda b, i: (b, i, 0)),
            scratch_shapes=[pltpu.VMEM((Tkv, 2 * H), compute_dtype)],    # [ekv|ek]
        ),
        compiler_params=pltpu.CompilerParams(
            # B parallel (megacore sharding); Tq-tile axis "arbitrary" so the
            # pl.when(program_id(1)==0) scratch re-init is sequentially valid.
            dimension_semantics=("parallel", "arbitrary"),
            vmem_limit_bytes=_vmem_limit_bytes()),
    )(q, kv, params["wq"], params["bq"], wkv, bkv, params["u"], params["v"])


def reference(q, kv, p):
    """Pure-JAX transcription of the PyTorch forward (for verification)."""
    qp = q @ p["wq"] + p["bq"]
    k = kv @ p["wk"] + p["bk"]
    v = kv @ p["wv"] + p["bv"]
    w_bias = p["u"] @ p["v"]                                   # (Tq, Tkv)
    A = jnp.exp(k[:, None, :, :] + w_bias[None, :, :, None])   # (B, Tq, Tkv, H)
    b = (A * v[:, None, :, :]).sum(-2) / A.sum(-2)             # (B, Tq, H)
    return jax.nn.sigmoid(qp) * b


if __name__ == "__main__":
    # hidden_dim = 128 keeps the output block lane-dense (multiple of 128).
    # NOTE: these demo sizes are for correctness only; perf tuning requires
    # every matmul dimension >= 128.
    B, dim, hidden_dim, q_T, kv_T, bias_dim = 2, 16, 128, 8, 8, 128

    key = jax.random.PRNGKey(0)
    ks = jax.random.split(key, 10)

    q = jax.random.normal(ks[0], (B, q_T, dim), jnp.float32)
    kv = jax.random.normal(ks[1], (B, kv_T, dim), jnp.float32)

    # PyTorch inits w_bias_u / w_bias_v to zeros; use small random values so the
    # bias path is exercised non-trivially.
    s = 0.1
    params = {
        "wq": jax.random.normal(ks[2], (dim, hidden_dim), jnp.float32) * s,
        "bq": jax.random.normal(ks[3], (1, hidden_dim), jnp.float32) * s,
        "wk": jax.random.normal(ks[4], (dim, hidden_dim), jnp.float32) * s,
        "bk": jax.random.normal(ks[5], (1, hidden_dim), jnp.float32) * s,
        "wv": jax.random.normal(ks[6], (dim, hidden_dim), jnp.float32) * s,
        "bv": jax.random.normal(ks[7], (1, hidden_dim), jnp.float32) * s,
        "u": jax.random.normal(ks[8], (q_T, bias_dim), jnp.float32) * 0.02,
        "v": jax.random.normal(ks[9], (bias_dim, kv_T), jnp.float32) * 0.02,
    }

    expected = reference(q, kv, params)

    # f32 matmul operands: tight check against the f32 reference.
    out_f32 = jax.block_until_ready(
        aft_full(q, kv, params, compute_dtype=jnp.float32))
    assert out_f32.shape == (B, q_T, hidden_dim)
    assert jnp.allclose(out_f32, expected, atol=1e-4, rtol=1e-4), (
        "Pallas kernel (f32) output does not match reference")

    # Default path: bf16 MXU operands with f32 accumulation (fast path on
    # v5e/v6e/v7x).
    out_bf16 = jax.block_until_ready(aft_full(q, kv, params))
    assert out_bf16.shape == (B, q_T, hidden_dim)
    assert jnp.allclose(out_bf16, expected, atol=5e-2, rtol=5e-2), (
        "Pallas kernel (bf16 operands) output does not match reference")

    print("KERNEL_OK")
</pallas_src>

<mosaic_0001>
module attributes {stable_mosaic.version = 11 : i64} {
  func.func @aft_full_kernel(%arg0: i32, %arg1: i32, %arg2: memref<1x8x16xf32, #tpu.memory_space<vmem>>, %arg3: memref<1x8x16xf32, #tpu.memory_space<vmem>>, %arg4: memref<16x128xf32, #tpu.memory_space<vmem>>, %arg5: memref<1x128xf32, #tpu.memory_space<vmem>>, %arg6: memref<16x256xf32, #tpu.memory_space<vmem>>, %arg7: memref<1x256xf32, #tpu.memory_space<vmem>>, %arg8: memref<8x128xf32, #tpu.memory_space<vmem>>, %arg9: memref<128x8xf32, #tpu.memory_space<vmem>>, %arg10: memref<1x8x128xf32, #tpu.memory_space<vmem>>, %arg11: memref<8x256xf32, #tpu.memory_space<vmem>>) attributes {dimension_semantics = [#tpu.dimension_semantics<parallel>, #tpu.dimension_semantics<arbitrary>], iteration_bounds = array<i64: 2, 1>, scalar_prefetch = 0 : i64, scratch_operands = 1 : i64, tpu.core_type = #tpu.core_type<tc>, window_params = [{transform_indices = @transform_0, window_bounds = array<i64: 1, 8, 16>}, {transform_indices = @transform_1, window_bounds = array<i64: 1, 8, 16>}, {pipeline_mode = #tpu.pipeline_mode<synchronous>, transform_indices = @transform_2, window_bounds = array<i64: 16, 128>}, {pipeline_mode = #tpu.pipeline_mode<synchronous>, transform_indices = @transform_3, window_bounds = array<i64: 1, 128>}, {pipeline_mode = #tpu.pipeline_mode<synchronous>, transform_indices = @transform_4, window_bounds = array<i64: 16, 256>}, {pipeline_mode = #tpu.pipeline_mode<synchronous>, transform_indices = @transform_5, window_bounds = array<i64: 1, 256>}, {transform_indices = @transform_6, window_bounds = array<i64: 8, 128>}, {pipeline_mode = #tpu.pipeline_mode<synchronous>, transform_indices = @transform_7, window_bounds = array<i64: 128, 8>}, {transform_indices = @transform_8, window_bounds = array<i64: 1, 8, 128>}]} {
    %c0_i32 = arith.constant 0 : i32
    %0 = arith.cmpi eq, %arg1, %c0_i32 : i32
    %1 = arith.extui %0 : i1 to i32
    %c0_i32_0 = arith.constant 0 : i32
    %2 = arith.cmpi ne, %1, %c0_i32_0 : i32
    scf.if %2 {
      %c0_21 = arith.constant 0 : index
      %c0_22 = arith.constant 0 : index
      %c0_23 = arith.constant 0 : index
      %37 = vector.load %arg3[%c0_21, %c0_22, %c0_23] : memref<1x8x16xf32, #tpu.memory_space<vmem>>, vector<1x8x16xf32>
      %38 = vector.shape_cast %37 : vector<1x8x16xf32> to vector<8x16xf32>
      %c0_24 = arith.constant 0 : index
      %c0_25 = arith.constant 0 : index
      %39 = vector.load %arg6[%c0_24, %c0_25] : memref<16x256xf32, #tpu.memory_space<vmem>>, vector<16x256xf32>
      %cst_26 = arith.constant dense<0.000000e+00> : vector<8x256xf32>
      %40 = tpu.matmul %38, %39, %cst_26 {dimension_numbers = #tpu.dot_dimension_numbers<[1], [0], [0], [1], [0, 0, 1, 1], [], []>} : vector<8x16xf32>, vector<16x256xf32>, vector<8x256xf32> -> vector<8x256xf32>
      %c0_27 = arith.constant 0 : index
      %c0_28 = arith.constant 0 : index
      %41 = vector.load %arg7[%c0_27, %c0_28] : memref<1x256xf32, #tpu.memory_space<vmem>>, vector<1x256xf32>
      %42 = vector.broadcast %41 : vector<1x256xf32> to vector<8x256xf32>
      %43 = arith.addf %40, %42 : vector<8x256xf32>
      %44 = vector.extract_strided_slice %43 {offsets = [0, 0], sizes = [8, 128], strides = [1, 1]} : vector<8x256xf32> to vector<8x128xf32>
      %45 = vector.extract_strided_slice %43 {offsets = [0, 128], sizes = [8, 128], strides = [1, 1]} : vector<8x256xf32> to vector<8x128xf32>
      %cst_29 = arith.constant dense<0xFF800000> : vector<128xf32>
      %46 = vector.multi_reduction <maximumf>, %44, %cst_29 [0] : vector<8x128xf32> to vector<128xf32>
      %47 = vector.shape_cast %46 : vector<128xf32> to vector<1x128xf32>
      %48 = vector.broadcast %47 : vector<1x128xf32> to vector<8x128xf32>
      %49 = arith.subf %44, %48 : vector<8x128xf32>
      %50 = math.exp %49 : vector<8x128xf32>
      %51 = arith.mulf %50, %45 : vector<8x128xf32>
      %52 = tpu.concatenate %51, %50 in 1 : vector<8x128xf32>, vector<8x128xf32> -> vector<8x256xf32>
      %c0_30 = arith.constant 0 : index
      %c0_31 = arith.constant 0 : index
      %53 = vector.load %arg11[%c0_30, %c0_31] : memref<8x256xf32, #tpu.memory_space<vmem>>, vector<8x256xf32>
      tpu.vector_store %arg11[%c0_30, %c0_31], %52 {strides = array<i32>} : memref<8x256xf32, #tpu.memory_space<vmem>>, vector<8x256xf32>,
    } else {
    }
    %c0 = arith.constant 0 : index
    %c0_1 = arith.constant 0 : index
    %3 = vector.load %arg8[%c0, %c0_1] : memref<8x128xf32, #tpu.memory_space<vmem>>, vector<8x128xf32>
    %c0_2 = arith.constant 0 : index
    %c0_3 = arith.constant 0 : index
    %4 = vector.load %arg9[%c0_2, %c0_3] : memref<128x8xf32, #tpu.memory_space<vmem>>, vector<128x8xf32>
    %cst = arith.constant dense<0.000000e+00> : vector<8x8xf32>
    %5 = tpu.matmul %3, %4, %cst {dimension_numbers = #tpu.dot_dimension_numbers<[1], [0], [0], [1], [0, 0, 1, 1], [], []>} : vector<8x128xf32>, vector<128x8xf32>, vector<8x8xf32> -> vector<8x8xf32>
    %cst_4 = arith.constant dense<0xFF800000> : vector<8xf32>
    %6 = vector.multi_reduction <maximumf>, %5, %cst_4 [1] : vector<8x8xf32> to vector<8xf32>
    %7 = vector.shape_cast %6 : vector<8xf32> to vector<8x1xf32>
    %8 = vector.broadcast %7 : vector<8x1xf32> to vector<8x8xf32>
    %9 = arith.subf %5, %8 : vector<8x8xf32>
    %10 = math.exp %9 : vector<8x8xf32>
    %c0_5 = arith.constant 0 : index
    %c0_6 = arith.constant 0 : index
    %11 = vector.load %arg11[%c0_5, %c0_6] : memref<8x256xf32, #tpu.memory_space<vmem>>, vector<8x256xf32>
    %cst_7 = arith.constant dense<0.000000e+00> : vector<8x256xf32>
    %12 = tpu.matmul %10, %11, %cst_7 {dimension_numbers = #tpu.dot_dimension_numbers<[1], [0], [0], [1], [0, 0, 1, 1], [], []>} : vector<8x8xf32>, vector<8x256xf32>, vector<8x256xf32> -> vector<8x256xf32>
    %13 = vector.extract_strided_slice %12 {offsets = [0, 0], sizes = [8, 128], strides = [1, 1]} : vector<8x256xf32> to vector<8x128xf32>
    %14 = vector.extract_strided_slice %12 {offsets = [0, 128], sizes = [8, 128], strides = [1, 1]} : vector<8x256xf32> to vector<8x128xf32>
    %15 = tpu.reciprocal %14 {approx = true} : vector<8x128xf32> -> vector<8x128xf32>
    %16 = arith.mulf %14, %15 : vector<8x128xf32>
    %cst_8 = arith.constant 2.000000e+00 : f32
    %17 = vector.broadcast %cst_8 : f32 to vector<8x128xf32>
    %18 = arith.subf %17, %16 : vector<8x128xf32>
    %19 = arith.mulf %15, %18 : vector<8x128xf32>
    %c0_9 = arith.constant 0 : index
    %c0_10 = arith.constant 0 : index
    %c0_11 = arith.constant 0 : index
    %20 = vector.load %arg2[%c0_9, %c0_10, %c0_11] : memref<1x8x16xf32, #tpu.memory_space<vmem>>, vector<1x8x16xf32>
    %21 = vector.shape_cast %20 : vector<1x8x16xf32> to vector<8x16xf32>
    %c0_12 = arith.constant 0 : index
    %c0_13 = arith.constant 0 : index
    %22 = vector.load %arg4[%c0_12, %c0_13] : memref<16x128xf32, #tpu.memory_space<vmem>>, vector<16x128xf32>
    %cst_14 = arith.constant dense<0.000000e+00> : vector<8x128xf32>
    %23 = tpu.matmul %21, %22, %cst_14 {dimension_numbers = #tpu.dot_dimension_numbers<[1], [0], [0], [1], [0, 0, 1, 1], [], []>} : vector<8x16xf32>, vector<16x128xf32>, vector<8x128xf32> -> vector<8x128xf32>
    %c0_15 = arith.constant 0 : index
    %c0_16 = arith.constant 0 : index
    %24 = vector.load %arg5[%c0_15, %c0_16] : memref<1x128xf32, #tpu.memory_space<vmem>>, vector<1x128xf32>
    %25 = vector.broadcast %24 : vector<1x128xf32> to vector<8x128xf32>
    %26 = arith.addf %23, %25 : vector<8x128xf32>
    %27 = arith.negf %26 : vector<8x128xf32>
    %28 = math.exp %27 : vector<8x128xf32>
    %cst_17 = arith.constant 1.000000e+00 : f32
    %29 = vector.broadcast %cst_17 : f32 to vector<8x128xf32>
    %30 = arith.addf %29, %28 : vector<8x128xf32>
    %31 = arith.divf %29, %30 : vector<8x128xf32>
    %32 = arith.mulf %13, %19 : vector<8x128xf32>
    %33 = arith.mulf %31, %32 : vector<8x128xf32>
    %c0_18 = arith.constant 0 : index
    %c0_19 = arith.constant 0 : index
    %c0_20 = arith.constant 0 : index
    %34 = vector.load %arg10[%c0_18, %c0_19, %c0_20] : memref<1x8x128xf32, #tpu.memory_space<vmem>>, vector<1x8x128xf32>
    %35 = vector.shape_cast %34 : vector<1x8x128xf32> to vector<8x128xf32>
    %36 = vector.shape_cast %33 : vector<8x128xf32> to vector<1x8x128xf32>
    tpu.vector_store %arg10[%c0_18, %c0_19, %c0_20], %36 {strides = array<i32>} : memref<1x8x128xf32, #tpu.memory_space<vmem>>, vector<1x8x128xf32>,
    return
  }
  func.func @transform_0(%arg0: i32, %arg1: i32) -> (i32, i32, i32) {
    %c0_i32 = arith.constant 0 : i32
    %c0_i32_0 = arith.constant 0 : i32
    return %arg0, %arg1, %c0_i32 : i32, i32, i32
  }
  func.func @transform_1(%arg0: i32, %arg1: i32) -> (i32, i32, i32) {
    %c0_i32 = arith.constant 0 : i32
    %c0_i32_0 = arith.constant 0 : i32
    %c0_i32_1 = arith.constant 0 : i32
    return %arg0, %c0_i32, %c0_i32_0 : i32, i32, i32
  }
  func.func @transform_2(%arg0: i32, %arg1: i32) -> (i32, i32) {
    %c0_i32 = arith.constant 0 : i32
    %c0_i32_0 = arith.constant 0 : i32
    %c0_i32_1 = arith.constant 0 : i32
    return %c0_i32, %c0_i32_0 : i32, i32
  }
  func.func @transform_3(%arg0: i32, %arg1: i32) -> (i32, i32) {
    %c0_i32 = arith.constant 0 : i32
    %c0_i32_0 = arith.constant 0 : i32
    %c0_i32_1 = arith.constant 0 : i32
    return %c0_i32, %c0_i32_0 : i32, i32
  }
  func.func @transform_4(%arg0: i32, %arg1: i32) -> (i32, i32) {
    %c0_i32 = arith.constant 0 : i32
    %c0_i32_0 = arith.constant 0 : i32
    %c0_i32_1 = arith.constant 0 : i32
    return %c0_i32, %c0_i32_0 : i32, i32
  }
  func.func @transform_5(%arg0: i32, %arg1: i32) -> (i32, i32) {
    %c0_i32 = arith.constant 0 : i32
    %c0_i32_0 = arith.constant 0 : i32
    %c0_i32_1 = arith.constant 0 : i32
    return %c0_i32, %c0_i32_0 : i32, i32
  }
  func.func @transform_6(%arg0: i32, %arg1: i32) -> (i32, i32) {
    %c0_i32 = arith.constant 0 : i32
    %c0_i32_0 = arith.constant 0 : i32
    return %arg1, %c0_i32 : i32, i32
  }
  func.func @transform_7(%arg0: i32, %arg1: i32) -> (i32, i32) {
    %c0_i32 = arith.constant 0 : i32
    %c0_i32_0 = arith.constant 0 : i32
    %c0_i32_1 = arith.constant 0 : i32
    return %c0_i32, %c0_i32_0 : i32, i32
  }
  func.func @transform_8(%arg0: i32, %arg1: i32) -> (i32, i32, i32) {
    %c0_i32 = arith.constant 0 : i32
    %c0_i32_0 = arith.constant 0 : i32
    return %arg0, %arg1, %c0_i32 : i32, i32, i32
  }
}

</mosaic_0001>

<bundles_post_ra>
// kernel: tpu_custom_call.1
= control target key start
LH: loop header
LB: loop body
LE: loop exit
PB: predicated region body
PF: predicated region fallthrough
CT: control target
= control target key end

     0   :  { %13 = vsyncpa [#allocation4], 0  ;;  %s1333_s0 = inlined_call_operand.vmem [shape: f32[2,8,16], index: 0, kind: input, shape index: {}]   ;;  %s1334_s1 = inlined_call_operand.vmem [shape: f32[2,8,16], index: 1, kind: input, shape index: {}]   ;;  %s1335_s2 = inlined_call_operand.vmem [shape: f32[16,128], index: 2, kind: input, shape index: {}]   ;;  %s1336_s3 = inlined_call_operand.vmem [shape: f32[1,128], index: 3, kind: input, shape index: {}]   ;;  %s1337_s4 = inlined_call_operand.vmem [shape: f32[16,256], index: 4, kind: input, shape index: {}]   ;;  %s1338_s5 = inlined_call_operand.vmem [shape: f32[1,256], index: 5, kind: input, shape index: {}]   ;;  %s1339_s6 = inlined_call_operand.vmem [shape: f32[8,128], index: 6, kind: input, shape index: {}]   ;;  %s1340_s7 = inlined_call_operand.vmem [shape: f32[128,8], index: 7, kind: input, shape index: {}]   ;;  %s1341_s8 = inlined_call_operand.hbm [shape: f32[2,8,128], index: 8, kind: output, shape index: {}]  }
   0x1   :  { %15 = vsyncpa [#allocation4 + $0x1], 0  ;;  %s1121_s27 = smov 0   ;;  %s1123_s28 = smov 0  }
   0x2   :  { %s1125_s29 = smov 0   ;;  %s1127_s30 = smov 0  }
   0x3   :  { %s1129_s9 = smov 0   ;;  %s1131_s10 = smov 0  }
   0x4 LB: > { %s848_s11 = sadd.s32 4294967295, %s1071_s10   ;;  %s849_s12 = sadd.s32 4294967294, %s1071_s10   ;;  %s1071_s10 = sphi %s1131_s10, %s21_s10   ;;  %s1067_s9 = sphi %s1129_s9, %s1351_s9   ;;  %s1063_s30 = sphi %s1127_s30, %s1350_s30   ;;  %s1059_s29 = sphi %s1125_s29, %s1349_s29   ;;  %s1055_s28 = sphi %s1123_s28, %s1348_s28   ;;  %s1051_s27 = sphi %s1121_s27, %s1347_s27  }
   0x5   : > { %s33_s13 = sadd.s32 1, %s1067_s9  ;;  %s227_s14 = sadd.s32 1, %s1059_s29 }
   0x6   : > { %p35_p0 = scmp.ge.s32.totalorder %s33_s13, 2  ;;  %p237_p1 = scmp.ne.s32.totalorder %s1059_s29, %s1055_s28 }
   0x7   : > { %p238_p2 = scmp.eq.s32.totalorder %s848_s11, 1  ;;  %p243_p3 = scmp.ne.s32.totalorder %s1055_s28, %s1051_s27 }
   0x8   : > { %s1353_s13 = smov (%p35_p0, %s33_s13), 0  ;;  %p244_p5 = scmp.eq.s32.totalorder %s849_s12, 1 }
   0x9   : > { %1343 = sst [smem:[#allocation6_spill]] %s1353_s13  ;;  %p1161_p4 = por %p238_p2, %p237_p1 }
   0xa   : > { %s222_s16 = ssub.s32 %s1067_s9, %s1353_s13  ;;  %p853_p6 = scmp.ge.s32.totalorder %s1071_s10, 1 }
   0xb   : > { %p225_p7 = scmp.eq.s32.totalorder %s222_s16, 0  ;;  %p1168_p8 = por %p244_p5, %p243_p3 }
   0xc   : > { %p301_p9 = scmp.lt.s32.totalorder %s1071_s10, 3 }
   0xd   : > { %s1174_s18 = scalar_select %p225_p7, %s1059_s29, %s227_s14  }
   0xe   : > { %p302_p10 = pnand %p853_p6, %p301_p9 }
   0xf   : > { %p345_p11 = scmp.lt.s32.totalorder (!%p302_p10), %s1063_s30, 1  ;;  %s342_s19 = sand.u32 (!%p302_p10), 1, %s1055_s28  }
  0x10   : > { %305 = sbr.rel (%p302_p10) target bundleno = 650 (0x28a), region = 52  ;;  %s854_s13 = sshll.u32 (!%p302_p10), %s342_s19, 3 }
  0x11   : > { %s863_s20 = sshll.u32 (!%p302_p10), %s1063_s30, 7  ;;  %s344_s22 = scalar_lea.vmem (!%p302_p10), [#allocation3], %s854_s13 }
  0x12   : > { %s748_s11 = scalar_lea.hbm (!%p302_p10), %s1341_s8, %s863_s20  ;;  %s736_s12 = scalar_lea.sflag (!%p302_p10), [#allocation4], %s342_s19 }
  0x13   : > { %s1075_s16 = smov (!%p302_p10), [#allocation3]  }
  0x15   : > { %v484_v0 = vld [vmem:[%s1340_s7 + $0x78] sm:$0xff]  ;;  %v1073_v1 = vmov 0.0   ;;  %v483_v2 = vld [vmem:[%s1340_s7 + $0x70] sm:$0xff]  ;;  %vm1074_vm0 = vmmov 0   ;;  %s1188_s23 = scalar_select %p345_p11, %s1063_s30, 1  ;;  %v482_v3 = vld [vmem:[%s1340_s7 + $0x68] sm:$0xff]  ;;  %v371_v23 = vlaneseq }
  0x16   : > { %886 = vmatprep.subr.mxu1 %v1073_v1  ;;  %918 = vmatprep.mubr.msk.f32.mxu1 %vm1074_vm0, %v1073_v1  ;;  %v481_v4 = vld [vmem:[%s1340_s7 + $0x60] sm:$0xff]  ;;  %v368_v5 = vld [vmem:[%s1337_s4 + $0x18] sm:$0xff]  ;;  %v367_v6 = vld [vmem:[%s1337_s4 + $0x10] sm:$0xff]  ;;  %vm381_vm1 = vcmask 130048   ;;  %vm555_vm2 = vcmask 64512  }
  0x17   : > { %887 = vmatpush3.msra.mxu1 %v484_v0  ;;  %449 = vmatprep.mubr.f32.mxu0 %v1073_v1  ;;  %s855_s26 = sshll.u32 %s1188_s23, 3  ;;  %v366_v7 = vld [vmem:[%s1337_s4 + $0x8] sm:$0xff]  ;;  %v365_v8 = vld [vmem:[%s1337_s4] sm:$0xff]  ;;  %v480_v9 = vld [vmem:[%s1340_s7 + $0x58] sm:$0xff]  ;;  %v372_v24 = vshrl.u32 %v371_v23, 7  ;;  %s999_s23 = sshll.u32 %s1075_s16, 4  ;;  %s1000_s23 = int_to_ptr.vmem [resolvable:$false] %s999_s23 }
  0x18   : > { %888 = vmatprep.subr.mxu1 %v1073_v1  ;;  %s355_s21 = scalar_lea.vmem %s1334_s1, %s855_s26  ;;  %413 = vmatprep.subr.mxu0 %v368_v5  ;;  %v479_v11 = vld [vmem:[%s1340_s7 + $0x50] sm:$0xff]  ;;  %v478_v12 = vld [vmem:[%s1340_s7 + $0x48] sm:$0xff]  ;;  %v477_v13 = vld [vmem:[%s1340_s7 + $0x40] sm:$0xff]  ;;  %s351_s25 = scalar_lea.vmem %s1333_s0, %s855_s26 }
  0x19   : > { %889 = vmatpush3.msra.mxu1 %v483_v2  ;;  %414 = vmatpush1.msra.mxu0 %v367_v6  ;;  %v364_v10 = vld [vmem:[%s355_s21] sm:$0xff]  ;;  %v476_v14 = vld [vmem:[%s1340_s7 + $0x38] sm:$0xff]  ;;  %v475_v15 = vld [vmem:[%s1340_s7 + $0x30] sm:$0xff]  ;;  %v373_v25 = vsub.s32 0, %v372_v24  ;;  %v377_v38 = vsub.s32 1, %v372_v24  ;;  %s750_s21 = sshll.u32 %s344_s22, 4  ;;  %s751_s21 = int_to_ptr.vmem [resolvable:$true] %s750_s21 }
  0x1a   : > { %890 = vmatprep.subr.mxu1 %v1073_v1  ;;  %415 = vmatprep.subr.mxu0 %v366_v7  ;;  %v474_v16 = vld [vmem:[%s1340_s7 + $0x28] sm:$0xff]  ;;  %v473_v17 = vld [vmem:[%s1340_s7 + $0x20] sm:$0xff]  ;;  %v472_v18 = vld [vmem:[%s1340_s7 + $0x18] sm:$0xff]  ;;  %s995_s14 = scalar_lea.vmem %s751_s21, 128  ;;  %s1001_s30 = scalar_lea.vmem %s1000_s23, 256 }
  0x1b   : > { %891 = vmatpush3.msra.mxu1 %v482_v3  ;;  %416 = vmatpush1.msra.mxu0 %v365_v8  ;;  %v471_v19 = vld [vmem:[%s1340_s7 + $0x10] sm:$0xff]  ;;  %v470_v20 = vld [vmem:[%s1340_s7 + $0x8] sm:$0xff]  ;;  %v469_v21 = vld [vmem:[%s1340_s7] sm:$0xff]  ;;  %p996_p12 = scmp.ne.s32.totalorder %s751_s21, %s995_s14  ;;  %p1002_p1 = scmp.lt.s32.totalorder %s751_s21, %s1000_s23 }
  0x1c   : > { %892 = vmatprep.subr.mxu1 %v1073_v1  ;;  %857 = vmatmul.mubr.msk.f32.vlgmr.msra.gmra.mxu0 %vm381_vm1, %v364_v10  ;;  %v468_v22 = vld [vmem:[%s1339_s6] sm:$0xff]  ;;  %v644_v50 = vld [vmem:[%s1335_s2 + $0x8] sm:$0xff]  ;;  %p1003_p2 = scmp.lt.s32.totalorder %s1001_s30, %s995_s14 }
  0x1d   : > { %893 = vmatpush3.msra.mxu1 %v481_v4  ;;  %631 = vmatprep.mubr.f32.mxu0 %v1073_v1  ;;  %v369_v26 = vld [vmem:[%s1338_s5] sm:$0x3]  ;;  %p997_p13 = pnand %p996_p12, %p1161_p4 }
  0x1e   : > { %894 = vmatprep.subr.mxu1 %v1073_v1  ;;  %v374_v27 = vrot.slane %v369_v26, %v373_v25  ;;  %v378_v42 = vrot.slane %v369_v26, %v377_v38  ;;  %v643_v52 = vld [vmem:[%s1335_s2] sm:$0xff]  ;;  %p1004_p3 = por %p1003_p2, %p1002_p1 }
  0x1f   : > { %895 = vmatpush3.msra.mxu1 %v480_v9  ;;  %v642_v53 = vld [vmem:[%s351_s25] sm:$0xff]  ;;  %p998_p0 = pneg %p997_p13 }
  0x20   : > { %896 = vmatprep.subr.mxu1 %v1073_v1  ;;  %v859_v56 = vld [vmem:[%s1336_s3] ss:$0 sm:$0xff] }
  0x21   : > { %897 = vmatpush3.msra.mxu1 %v479_v11  ;;  %p1005_p5 = pnand %p1004_p3, %p998_p0 }
  0x22   : > { %898 = vmatprep.subr.mxu1 %v1073_v1 }
  0x23   : > { %899 = vmatpush3.msra.mxu1 %v478_v12 }
  0x24   : > { %900 = vmatprep.subr.mxu1 %v1073_v1 }
  0x25   : > { %901 = vmatpush3.msra.mxu1 %v477_v13 }
  0x26   : > { %902 = vmatprep.subr.mxu1 %v1073_v1 }
  0x27   : > { %903 = vmatpush3.msra.mxu1 %v476_v14 }
  0x28   : > { %904 = vmatprep.subr.mxu1 %v1073_v1 }
  0x29   : > { %905 = vmatpush3.msra.mxu1 %v475_v15 }
  0x2a   : > { %906 = vmatprep.subr.mxu1 %v1073_v1 }
  0x2b   : > { %907 = vmatpush3.msra.mxu1 %v474_v16 }
  0x2c   : > { %908 = vmatprep.subr.mxu1 %v1073_v1 }
  0x2d   : > { %909 = vmatpush3.msra.mxu1 %v473_v17 }
  0x2e   : > { %910 = vmatprep.subr.mxu1 %v1073_v1 }
  0x2f   : > { %911 = vmatpush3.msra.mxu1 %v472_v18 }
  0x30   : > { %912 = vmatprep.subr.mxu1 %v1073_v1 }
  0x31   : > { %913 = vmatpush3.msra.mxu1 %v471_v19 }
  0x32   : > { %914 = vmatprep.subr.mxu1 %v1073_v1 }
  0x33   : > { %915 = vmatpush3.msra.mxu1 %v470_v20 }
  0x34   : > { %916 = vmatprep.subr.mxu1 %v1073_v1 }
  0x35   : > { %917 = vmatpush3.msra.mxu1 %v469_v21 }
  0x36   : > { %919 = vmatmul.mubr.f32.vlgmr.msra.gmra.mxu1 %v468_v22 }
  0xdc   : > { %v451_v28 = vpop.f32.mrf.mxu0 }
  0xdd   : > { %v452_v29 = vadd.f32 %v451_v28, %v374_v27 }
  0xde   : > { %v453_v43 = vpop.f32.mrf.mxu0 }
  0xdf   : > { %v456_v30 = vrot.slane %v452_v29, 4  ;;  %v454_v44 = vadd.f32 %v453_v43, %v378_v42 }
  0xe1   : > { %v457_v31 = vmax.f32 %v452_v29, %v456_v30 }
  0xe3   : > { %v458_v32 = vrot.slane %v457_v31, 2 }
  0xe5   : > { %v459_v33 = vmax.f32 %v457_v31, %v458_v32 }
  0xe7   : > { %v460_v34 = vrot.slane %v459_v33, 1 }
  0xe9   : > { %v461_v35 = vmax.f32 %v459_v33, %v460_v34 }
  0xeb   : > { %v462_v36 = vsub.f32 %v452_v29, %v461_v35 }
  0xed   : > { %v463_v37 = vmul.f32 1.442695, %v462_v36 }
  0xef   : > { %985 = vpow2.f32 %v463_v37 }
  0xf6   : > { %v551_v39 = vpop.f32.mrf.mxu1 }
  0xf7   : > { %v556_v40 = vsel %vm555_vm2, %v551_v39, -inf }
  0xf8   : > { %v920_v41 = vpop.f32.mrf.mxu1  ;;  %557 = vmax.xlane.f32.xlu0 %v556_v40 }
  0xfc   : > { %v986_v45 = vpop.eup %985 }
  0xfd   : > { %v465_v46 = vmul.f32 %v986_v45, %v454_v44  ;;  %597 = vmatprep.subr.mxu0 %v986_v45 }
  0xff   : > { %598 = vmatpush1.msra.mxu0 %v465_v46 }
 0x100   : > { %921 = vmatprep.subr.mxu0 %v1073_v1 }
 0x181   : > { %v558_v47 = vpop.xlane.xlu0 %557 }
 0x182   : > { %v559_v48 = vsub.f32 %v551_v39, %v558_v47 }
 0x184   : > { %v560_v49 = vmul.f32 1.442695, %v559_v48 }
 0x186   : > { %987 = vpow2.f32 %v560_v49 }
 0x193   : > { %v988_v51 = vpop.eup %987 }
 0x194   : > { %858 = vmatmul.mubr.msk.f32.vlgmr.msra.gmra.mxu0 %vm555_vm2, %v988_v51 }
 0x195   : > { %922 = vmatpush3.msra.mxu0 %v644_v50  ;;  %925 = vmatprep.mubr.msk.f32.mxu0 %vm1074_vm0, %v1073_v1 }
 0x196   : > { %923 = vmatprep.subr.mxu0 %v1073_v1 }
 0x197   : > { %924 = vmatpush3.msra.mxu0 %v643_v52 }
 0x198   : > { %926 = vmatmul.mubr.msk.f32.vlgmr.msra.gmra.mxu0 %vm381_vm1, %v642_v53 }
 0x254   : > { %v633_v54 = vpop.f32.mrf.mxu0 }
 0x256   : > { %v635_v55 = vpop.f32.mrf.mxu0 }
 0x257   : > { %989 = vrcp.f32 %v635_v55 }
 0x258   : > { %v722_v57 = vpop.f32.mrf.mxu0 }
 0x259   : > { %v723_v58 = vadd.f32 %v859_v56, %v722_v57 }
 0x25a   : > { %v927_v59 = vpop.f32.mrf.mxu0 }
 0x25b   : > { %v861_v60 = vmul.f32 -1.442695, %v723_v58 }
 0x25d   : > { %991 = vpow2.f32 %v861_v60 }
 0x264   : > { %v990_v61 = vpop.eup %989 }
 0x265   : > { %v639_v0 = vmul.f32 %v990_v61, %v635_v55 }
 0x267   : > { %v640_v1 = vsub.f32 2.0, %v639_v0 }
 0x269   : > { %v641_v2 = vmul.f32 %v990_v61, %v640_v1 }
 0x26a   : > { %v992_v62 = vpop.eup %991 }
 0x26b   : > { %v729_v63 = vadd.f32 1.0, %v992_v62  ;;  %v732_v3 = vmul.f32 %v641_v2, %v633_v54 }
 0x26d   : > { %993 = vrcp.f32 %v729_v63 }
 0x27a   : > { %v994_v4 = vpop.eup %993 }
 0x27b   : > { %v733_v5 = vmul.f32 %v994_v4, %v732_v3 }
 0x27d   : > { %734 = vst [vmem:[%s344_s22] sm:$0xff] %v733_v5 }
 0x27e   : > { %1008 = shalt.err (!%p1005_p5)
}
 0x27f   : > { %s1009_s26 = scalar_lea.hbm %s748_s11, 128  ;;  %s1013_s20 = scalar_lea.hbm %s1341_s8, 256 }
 0x280   : > { %p1010_p6 = scmp.ne.s32.totalorder %s748_s11, %s1009_s26  ;;  %p1014_p10 = scmp.lt.s32.totalorder %s748_s11, %s1341_s8 }
 0x281   : > { %p1015_p11 = scmp.lt.s32.totalorder %s1013_s20, %s1009_s26 }
 0x282   : > { %p1011_p7 = pnand %p1010_p6, %p1161_p4 }
 0x283   : > { %p1016_p12 = por %p1015_p11, %p1014_p10 }
 0x284   : > { %p1012_p9 = pneg %p1011_p7 }
 0x286   : > { %p1017_p13 = pnand %p1016_p12, %p1012_p9 }
 0x288   : > { %1020 = shalt.err (!%p1017_p13)
}
 0x289   : > { %928 = dma.vmem_to_hbm [thread:$0]  (%p1161_p4), %s751_s21, 128, %s748_s11, %s736_s12  }
 0x28a PF: > { %p934_p0 = scmp.ge.s32.totalorder %s1071_s10, 2  ;;  %s762_s25 = sand.u32 1, %s1051_s27  }
 0x28b   : > { %s763_s14 = scalar_lea.sflag [#allocation4], %s762_s25 }
 0x28c   : > { %p931_p1 = pnand %p934_p0, %p1168_p8 }
 0x28e   : > { %p932_p2 = pneg %p931_p1 }
 0x290   : > { %1046 = dma.done.wait (%p932_p2), %s763_s14, 128  }
 0x291   : > { %1048 = vsyncadd (%p932_p2), %s763_s14, 4294967168  ;;  %s21_s10 = sadd.s32 1, %s1071_s10   ;;  %s1346_s15 = sld [smem:[#allocation6_spill]] }
 0x292   : > { %p18_p3 = scmp.ge.s32.totalorder %s21_s10, 4   ;;  %s1347_s27 = smov %s1055_s28 }
 0x293   : > { %s1348_s28 = smov %s1059_s29  ;;  %s1349_s29 = smov %s1174_s18 }
 0x294   : > { %s1350_s30 = smov %s1067_s9  ;;  %20 = sbr.rel (!%p18_p3) target bundleno = 4 (0x4), region = 97 }
 0x297   : > { %s1351_s9 = smov %s1346_s15 }
 0x299   :  { %768 = vsyncpa [#allocation4], 1 }
 0x29a   :  { %770 = vsyncpa [#allocation4 + $0x1], 1 }

</bundles_post_ra>
